<compile_context>
chip_gen: v7x
topology: tpu7x:2x2x1
jax: 0.10.0
libtpu: 0.0.40
codegen_flags: <defaults>
</compile_context>

<pallas_src>
import jax
import jax.numpy as jnp
from jax.experimental import pallas as pl
from jax.experimental.pallas import tpu as pltpu


# ---------------------------------------------------------------------------
# Kernels
# ---------------------------------------------------------------------------
def _reduction_matmul_kernel(x_ref, w_ref, o_ref):
    """Plain (tm, K) @ (K, tn) tile matmul with f32 accumulation on the MXU."""
    o_ref[...] = jnp.dot(
        x_ref[...], w_ref[...], preferred_element_type=jnp.float32
    ).astype(o_ref.dtype)


def _fused_merge_matmul_kernel(x_ref, w_ref, o_ref):
    """2x2 patch merge + reduction fused in one grid step.

    x_ref: (gm, 2, W2, 2C)  gm row-pair groups of the original (B, H, W, C)
                            tensor in native layout (pure reshape, no HBM
                            transpose).  Dim 1 is the row parity.
    w_ref: (4C, tn)         reduction weight, row-parity-major channel order.
    o_ref: (gm*W2, tn)
    """
    gm, _, w2, c2 = x_ref.shape
    # Layout-trivial collapses: this path is only taken when W2 % 8 == 0 and
    # 2C % 128 == 0 (f32), so each (W2, 2C) slab is whole (8, 128) tiles.
    even = x_ref[:, 0, :, :].reshape(gm * w2, c2)
    odd = x_ref[:, 1, :, :].reshape(gm * w2, c2)
    acc = jnp.dot(even, w_ref[:c2, :], preferred_element_type=jnp.float32)
    acc = acc + jnp.dot(odd, w_ref[c2:, :], preferred_element_type=jnp.float32)
    o_ref[...] = acc.astype(o_ref.dtype)


# ---------------------------------------------------------------------------
# Wrapper
# ---------------------------------------------------------------------------
def patch_merging(x, w, x_size, *, tile_tokens=256, tile_n=256):
    """PatchMerging forward.

    x: (B, H*W, C)     input tokens
    w: (out_dim, 4*C)  weight of nn.Linear(4*C, out_dim, bias=False)
    x_size: (H, W)
    returns: (B, H*W//4, out_dim)
    """
    H, W = x_size
    B, L, C = x.shape
    assert L == H * W, "input feature has wrong size"
    assert H % 2 == 0 and W % 2 == 0, f"x size ({H}*{W}) are not even."
    out_dim, four_c = w.shape
    assert four_c == 4 * C

    K = 4 * C
    C2 = 2 * C
    H2, W2 = H // 2, W // 2
    G = B * H2          # merged row groups
    M = G * W2          # merged tokens
    in_isz = x.dtype.itemsize
    out_isz = in_isz

    # Reduction weight in "row-parity-major" channel order k' = 2*rp + wp
    # (even-row channels first, then odd-row channels), transposed to
    # (4C, out_dim).  PyTorch concat order is k = 2*wp + rp, so we permute the
    # tiny weight instead of the large activations.
    wt = (
        w.reshape(out_dim, 2, 2, C)     # (o, wp, rp, c)
        .transpose(0, 2, 1, 3)          # (o, rp, wp, c)
        .reshape(out_dim, K)
        .T                              # (4C, out_dim)
    )

    # Very narrow outputs: pad N up to one lane tile (weight-side only) so the
    # MXU rhs / output stores stay lane-dense.  Negligible at that size.
    N = out_dim
    if N < 128:
        wt = jnp.pad(wt, ((0, 0), (0, 128 - N)))
        N = 128
    tn = N if N <= tile_n else tile_n

    # VMEM budget for the double-buffered working set.
    budget = 28 * 1024 * 1024

    def wset(tok, n):
        return 2 * (tok * K + K * n) * in_isz + 2 * tok * n * out_isz

    cost = pl.CostEstimate(
        flops=int(2 * M * K * out_dim),
        transcendentals=0,
        bytes_accessed=int((M * K + K * out_dim) * in_isz + M * out_dim * out_isz),
    )
    cparams = pltpu.CompilerParams(
        dimension_semantics=("parallel", "parallel"),
        vmem_limit_bytes=48 * 1024 * 1024,
    )

    # Fused path is only taken when the in-kernel merge is layout-trivial.
    fused = (in_isz == 4) and (W2 % 8 == 0) and (C2 % 128 == 0)

    if fused:
        # Native layout, reshape only (no HBM data movement): (G, 2, W2, 2C).
        x4 = x.reshape(G, 2, W2, C2)
        gm = min(G, max(1, tile_tokens // W2))
        while wset(gm * W2, tn) > budget:
            if tn >= 256 and tn % 256 == 0:
                tn //= 2
            elif gm > 1:
                gm = max(1, gm // 2)
            else:
                break
        tok = gm * W2
        grid = (pl.cdiv(G, gm), pl.cdiv(N, tn))
        out = pl.pallas_call(
            _fused_merge_matmul_kernel,
            out_shape=jax.ShapeDtypeStruct((M, N), x.dtype),
            grid_spec=pltpu.PrefetchScalarGridSpec(
                num_scalar_prefetch=0,
                grid=grid,
                in_specs=[
                    pl.BlockSpec((gm, 2, W2, C2), lambda i, j: (i, 0, 0, 0)),
                    pl.BlockSpec((K, tn), lambda i, j: (0, j)),
                ],
                out_specs=pl.BlockSpec((tok, tn), lambda i, j: (i, j)),
            ),
            compiler_params=cparams,
            cost_estimate=cost,
        )(x4, wt)
    else:
        # Generic path: 2x2 merge as wrapper-side layout plumbing (contiguous
        # 2C chunks thanks to the permuted weight), then a plain tiled matmul.
        xm = (
            x.reshape(B, H2, 2, W2, C2)
            .transpose(0, 1, 3, 2, 4)    # (B, H2, W2, rp, 2C)
            .reshape(M, K)
        )
        tm = M if M <= tile_tokens else tile_tokens
        while wset(tm, tn) > budget:
            if tn >= 256 and tn % 256 == 0:
                tn //= 2
            elif tm >= 256 and tm % 16 == 0:
                tm //= 2
            else:
                break
        grid = (pl.cdiv(M, tm), pl.cdiv(N, tn))
        out = pl.pallas_call(
            _reduction_matmul_kernel,
            out_shape=jax.ShapeDtypeStruct((M, N), x.dtype),
            grid_spec=pltpu.PrefetchScalarGridSpec(
                num_scalar_prefetch=0,
                grid=grid,
                in_specs=[
                    pl.BlockSpec((tm, K), lambda i, j: (i, 0)),
                    pl.BlockSpec((K, tn), lambda i, j: (0, j)),
                ],
                out_specs=pl.BlockSpec((tm, tn), lambda i, j: (i, j)),
            ),
            compiler_params=cparams,
            cost_estimate=cost,
        )(xm, wt)

    if N != out_dim:
        out = out[:, :out_dim]
    return out.reshape(B, H2 * W2, out_dim)


# ---------------------------------------------------------------------------
# Pure-JAX reference (direct port of the PyTorch module).
# ---------------------------------------------------------------------------
def patch_merging_ref(x, w, x_size):
    H, W = x_size
    B, L, C = x.shape
    xr = x.reshape(B, H, W, C)
    x0 = xr[:, 0::2, 0::2, :]
    x1 = xr[:, 1::2, 0::2, :]
    x2 = xr[:, 0::2, 1::2, :]
    x3 = xr[:, 1::2, 1::2, :]
    xm = jnp.concatenate([x0, x1, x2, x3], axis=-1).reshape(B, -1, 4 * C)
    return jnp.einsum(
        "blk,ok->blo", xm, w, precision=jax.lax.Precision.HIGHEST
    ).astype(x.dtype)


if __name__ == "__main__":
    key = jax.random.PRNGKey(0)

    def run_case(B, H, W, C, out_dim, k):
        kx, kw = jax.random.split(k)
        x = jax.random.normal(kx, (B, H * W, C), dtype=jnp.float32)
        w = 0.1 * jax.random.normal(kw, (out_dim, 4 * C), dtype=jnp.float32)
        out = jax.block_until_ready(patch_merging(x, w, (H, W)))
        ref = patch_merging_ref(x, w, (H, W))
        assert out.shape == (B, (H // 2) * (W // 2), out_dim)
        err = float(jnp.max(jnp.abs(out - ref)))
        assert jnp.allclose(out, ref, atol=2e-3, rtol=2e-3), f"max err {err}"

    k1, k2 = jax.random.split(key)
    # Small case (generic wrapper-merge + tiled matmul path).
    run_case(B=2, H=16, W=16, C=4, out_dim=8, k=k1)
    # Lane-aligned case (fused in-kernel 2x2-merge path).
    run_case(B=2, H=16, W=16, C=64, out_dim=128, k=k2)

    print("KERNEL_OK")
</pallas_src>

<mosaic_0001>
module attributes {stable_mosaic.version = 11 : i64} {
  func.func @_reduction_matmul_kernel(%arg0: i32, %arg1: i32, %arg2: memref<128x16xf32, #tpu.memory_space<vmem>>, %arg3: memref<16x128xf32, #tpu.memory_space<vmem>>, %arg4: memref<128x128xf32, #tpu.memory_space<vmem>>) attributes {dimension_semantics = [#tpu.dimension_semantics<parallel>, #tpu.dimension_semantics<parallel>], iteration_bounds = array<i64: 1, 1>, scalar_prefetch = 0 : i64, scratch_operands = 0 : i64, tpu.core_type = #tpu.core_type<tc>, window_params = [{transform_indices = @transform_0, window_bounds = array<i64: 128, 16>}, {transform_indices = @transform_1, window_bounds = array<i64: 16, 128>}, {transform_indices = @transform_2, window_bounds = array<i64: 128, 128>}]} {
    %c0 = arith.constant 0 : index
    %c0_0 = arith.constant 0 : index
    %0 = vector.load %arg2[%c0, %c0_0] : memref<128x16xf32, #tpu.memory_space<vmem>>, vector<128x16xf32>
    %c0_1 = arith.constant 0 : index
    %c0_2 = arith.constant 0 : index
    %1 = vector.load %arg3[%c0_1, %c0_2] : memref<16x128xf32, #tpu.memory_space<vmem>>, vector<16x128xf32>
    %cst = arith.constant dense<0.000000e+00> : vector<128x128xf32>
    %2 = tpu.matmul %0, %1, %cst {dimension_numbers = #tpu.dot_dimension_numbers<[1], [0], [0], [1], [0, 0, 1, 1], [], []>} : vector<128x16xf32>, vector<16x128xf32>, vector<128x128xf32> -> vector<128x128xf32>
    %c0_3 = arith.constant 0 : index
    %c0_4 = arith.constant 0 : index
    %3 = vector.load %arg4[%c0_3, %c0_4] : memref<128x128xf32, #tpu.memory_space<vmem>>, vector<128x128xf32>
    tpu.vector_store %arg4[%c0_3, %c0_4], %2 {strides = array<i32>} : memref<128x128xf32, #tpu.memory_space<vmem>>, vector<128x128xf32>,
    return
  }
  func.func @transform_0(%arg0: i32, %arg1: i32) -> (i32, i32) {
    %c0_i32 = arith.constant 0 : i32
    %c0_i32_0 = arith.constant 0 : i32
    return %arg0, %c0_i32 : i32, i32
  }
  func.func @transform_1(%arg0: i32, %arg1: i32) -> (i32, i32) {
    %c0_i32 = arith.constant 0 : i32
    %c0_i32_0 = arith.constant 0 : i32
    return %c0_i32, %arg1 : i32, i32
  }
  func.func @transform_2(%arg0: i32, %arg1: i32) -> (i32, i32) {
    %c0_i32 = arith.constant 0 : i32
    return %arg0, %arg1 : i32, i32
  }
}

</mosaic_0001>

<bundles_post_ra>
// kernel: tpu_custom_call.1
= control target key start
LH: loop header
LB: loop body
LE: loop exit
PB: predicated region body
PF: predicated region fallthrough
CT: control target
= control target key end

     0   :  { %vm30_vm0 = vcmask 130048   ;;  %s451_s0 = inlined_call_operand.vmem [shape: f32[128,16], index: 0, kind: input, shape index: {}]   ;;  %s452_s1 = inlined_call_operand.vmem [shape: f32[16,128], index: 1, kind: input, shape index: {}]   ;;  %s453_s2 = inlined_call_operand.hbm [shape: f32[128,128], index: 2, kind: output, shape index: {}]  }
   0x1   :  { %v28_v0 = vld [vmem:[%s452_s1] sm:$0xff]  ;;  %v29_v1 = vld [vmem:[%s452_s1 + $0x8] sm:$0xff]  ;;  %v14_v7 = vld [vmem:[%s451_s0 + $0x10] sm:$0xff] }
   0x2   :  { %v12_v2 = vld [vmem:[%s451_s0] sm:$0xff]  ;;  %v318_v3 = vpack.c.bf16 %v29_v1, %v28_v0  ;;  %v13_v5 = vld [vmem:[%s451_s0 + $0x8] sm:$0xff]  ;;  %v22_v8 = vld [vmem:[%s451_s0 + $0x50] sm:$0xff] }
   0x3   :  { %294 = vmatprep.mubr.msk.f32.mxu0 %vm30_vm0, %v12_v2  ;;  %v20_v4 = vld [vmem:[%s451_s0 + $0x40] sm:$0xff]  ;;  %v21_v6 = vld [vmem:[%s451_s0 + $0x48] sm:$0xff] }
   0x4   :  { %306 = vmatprep.mubr.msk.f32.mxu1 %vm30_vm0, %v20_v4  ;;  %319 = vmatprep.subr.bf16.mxu0 %v318_v3 }
   0x5   :  { %322 = vmatprep.subr.bf16.mxu1 %v318_v3  ;;  %321 = vmatpush3.bf16.msra.mxu0 %v318_v3 }
   0x6   :  { %323 = vmatpush3.bf16.msra.mxu1 %v318_v3 }
   0x7   :  { %7 = vsyncpa [#allocation3], 0  ;;  %v15_v9 = vld [vmem:[%s451_s0 + $0x18] sm:$0xff]  ;;  %v16_v11 = vld [vmem:[%s451_s0 + $0x20] sm:$0xff] }
   0x8   :  { %295 = vmatmul.mubr.msk.f32.vlgmr.msra.gmra.mrb[0].mxu0 %vm30_vm0, %v13_v5  ;;  %v23_v10 = vld [vmem:[%s451_s0 + $0x58] sm:$0xff]  ;;  %v24_v12 = vld [vmem:[%s451_s0 + $0x60] sm:$0xff]  ;;  %v17_v13 = vld [vmem:[%s451_s0 + $0x28] sm:$0xff] }
   0x9   :  { %307 = vmatmul.mubr.msk.f32.vlgmr.msra.gmra.mrb[0].mxu1 %vm30_vm0, %v21_v6  ;;  %297 = vmatprep.mubr.msk.f32.mxu0 %vm30_vm0, %v14_v7  ;;  %v25_v14 = vld [vmem:[%s451_s0 + $0x68] sm:$0xff]  ;;  %v18_v15 = vld [vmem:[%s451_s0 + $0x30] sm:$0xff]  ;;  %v19_v17 = vld [vmem:[%s451_s0 + $0x38] sm:$0xff] }
   0xa   :  { %309 = vmatprep.mubr.msk.f32.mxu1 %vm30_vm0, %v22_v8  ;;  %v26_v16 = vld [vmem:[%s451_s0 + $0x70] sm:$0xff]  ;;  %v27_v18 = vld [vmem:[%s451_s0 + $0x78] sm:$0xff]  ;;  %s351_s0 = smov [#allocation2]  }
   0xb   :  { %s245_s16 = sshll.u32 %s351_s0, 4  ;;  %s246_s16 = int_to_ptr.vmem [resolvable:$true] %s245_s16 }
   0xc   :  { %298 = vmatmul.mubr.msk.f32.gmra.mrb[2].mxu0 %vm30_vm0, %v15_v9  ;;  %s327_s17 = scalar_lea.vmem %s246_s16, 2048  ;;  %p332_p1 = scmp.lt.s32.totalorder %s246_s16, %s246_s16 }
   0xd   :  { %310 = vmatmul.mubr.msk.f32.gmra.mrb[2].mxu1 %vm30_vm0, %v23_v10  ;;  %300 = vmatprep.mubr.msk.f32.mxu0 %vm30_vm0, %v16_v11  ;;  %p328_p0 = scmp.ne.s32.totalorder %s246_s16, %s327_s17  ;;  %p333_p2 = scmp.lt.s32.totalorder %s327_s17, %s327_s17 }
   0xe   :  { %312 = vmatprep.mubr.msk.f32.mxu1 %vm30_vm0, %v24_v12 }
   0xf   :  { %p334_p3 = por %p333_p2, %p332_p1 }
  0x10   :  { %301 = vmatmul.mubr.msk.f32.gmra.mrb[4].mxu0 %vm30_vm0, %v17_v13 }
  0x11   :  { %313 = vmatmul.mubr.msk.f32.gmra.mrb[4].mxu1 %vm30_vm0, %v25_v14  ;;  %303 = vmatprep.mubr.msk.f32.mxu0 %vm30_vm0, %v18_v15  ;;  %p335_p4 = pnand %p334_p3, %p328_p0 }
  0x12   :  { %315 = vmatprep.mubr.msk.f32.mxu1 %vm30_vm0, %v26_v16 }
  0x14   :  { %304 = vmatmul.mubr.msk.f32.gmra.mrb[6].mxu0 %vm30_vm0, %v19_v17 }
  0x15   :  { %316 = vmatmul.mubr.msk.f32.gmra.mrb[6].mxu1 %vm30_vm0, %v27_v18 }
  0xdb   :  { %v296_v19 = vpop.f32.mrb[0].mxu0 }
  0xdc   :  { %v308_v20 = vpop.f32.mrb[0].mxu1  ;;  %225 = vst [vmem:[#allocation2 + $0x8] sm:$0xff] %v296_v19  ;;  %v145_v21 = vpop.f32.mrb[1].mxu0 }
  0xdd   :  { %233 = vst [vmem:[#allocation2 + $0x48] sm:$0xff] %v308_v20  ;;  %v185_v22 = vpop.f32.mrb[1].mxu1  ;;  %224 = vst [vmem:[#allocation2] sm:$0xff] %v145_v21 }
  0xde   :  { %232 = vst [vmem:[#allocation2 + $0x40] sm:$0xff] %v185_v22 }
  0xdf   :  { %v299_v23 = vpop.f32.mrb[2].mxu0 }
  0xe0   :  { %v311_v24 = vpop.f32.mrb[2].mxu1  ;;  %227 = vst [vmem:[#allocation2 + $0x18] sm:$0xff] %v299_v23  ;;  %v155_v25 = vpop.f32.mrb[3].mxu0 }
  0xe1   :  { %235 = vst [vmem:[#allocation2 + $0x58] sm:$0xff] %v311_v24  ;;  %v195_v26 = vpop.f32.mrb[3].mxu1  ;;  %226 = vst [vmem:[#allocation2 + $0x10] sm:$0xff] %v155_v25 }
  0xe2   :  { %234 = vst [vmem:[#allocation2 + $0x50] sm:$0xff] %v195_v26 }
  0xe3   :  { %v302_v27 = vpop.f32.mrb[4].mxu0 }
  0xe4   :  { %v314_v28 = vpop.f32.mrb[4].mxu1  ;;  %229 = vst [vmem:[#allocation2 + $0x28] sm:$0xff] %v302_v27  ;;  %v165_v29 = vpop.f32.mrb[5].mxu0 }
  0xe5   :  { %237 = vst [vmem:[#allocation2 + $0x68] sm:$0xff] %v314_v28  ;;  %v205_v30 = vpop.f32.mrb[5].mxu1  ;;  %228 = vst [vmem:[#allocation2 + $0x20] sm:$0xff] %v165_v29 }
  0xe6   :  { %236 = vst [vmem:[#allocation2 + $0x60] sm:$0xff] %v205_v30 }
  0xe7   :  { %v305_v31 = vpop.f32.mrb[6].mxu0 }
  0xe8   :  { %v317_v32 = vpop.f32.mrb[6].mxu1  ;;  %231 = vst [vmem:[#allocation2 + $0x38] sm:$0xff] %v305_v31  ;;  %v175_v33 = vpop.f32.mrb[7].mxu0 }
  0xe9   :  { %239 = vst [vmem:[#allocation2 + $0x78] sm:$0xff] %v317_v32  ;;  %v215_v34 = vpop.f32.mrb[7].mxu1  ;;  %230 = vst [vmem:[#allocation2 + $0x30] sm:$0xff] %v175_v33 }
  0xea   :  { %238 = vst [vmem:[#allocation2 + $0x70] sm:$0xff] %v215_v34 }
  0xeb   :  { %338 = shalt.err (!%p335_p4)
}
  0xec   :  { %s339_s19 = scalar_lea.hbm %s453_s2, 2048 }
  0xed   :  { %p340_p5 = scmp.ne.s32.totalorder %s453_s2, %s339_s19  ;;  %p343_p6 = scmp.lt.u32.totalorder %s339_s19, %s453_s2 }
  0xef   :  { %p345_p7 = pnand %p343_p6, %p340_p5 }
  0xf1   :  { %348 = shalt.err (!%p345_p7)
}
  0xf2   :  { %s352_s24 = smov 128   ;;  %s353_s25 = smov 8  }
  0xf3   :  { %251 = dma.vmem_to_hbm [thread:$0]  %s246_s16, 2048, %s453_s2, [#allocation3], %s352_s24, %s352_s24, %s353_s25  }
  0xf4   :  { %349 = dma.done.wait [#allocation3], 2048  }
  0xf5   :  { %350 = vsyncadd [#allocation3], 4294965248 }
  0xf6   :  { %255 = vsyncpa [#allocation3], 1 }

</bundles_post_ra>
